<compile_context>
chip_gen: v7x
topology: tpu7x:2x2x1
jax: 0.10.0
libtpu: 0.0.40
codegen_flags: <defaults>
</compile_context>

<pallas_src>
from functools import partial

import jax
import jax.numpy as jnp
from jax.experimental import pallas as pl
from jax.experimental.pallas import tpu as pltpu

NEG_SLOPE = 0.01  # default negative_slope of nn.LeakyReLU


def _round_up(a, b):
    return (a + b - 1) // b * b


def _leaky_relu(x):
    return jnp.where(x > 0, x, NEG_SLOPE * x)


def _mlp_kernel(x_ref, w1_ref, b1_ref, w2_ref, b2_ref, w3_ref, b3_ref, o_ref, *, d_in):
    # x_ref: (D_in, TB)   batch on lanes
    # w1: (64, D_in)  b1: (64, 1)
    # w2: (32, 64)    b2: (32, 1)
    # w3: (1, 32)     b3: (1, 1)
    # o_ref: (1, TB)
    xT = x_ref[...]

    if d_in == 1:
        # K=1 matmul wastes the MXU: do the outer product on the VPU instead.
        h1 = w1_ref[...] * xT + b1_ref[...]                  # (64,1)*(1,TB) -> (64,TB)
    else:
        h1 = (
            jnp.dot(w1_ref[...], xT, preferred_element_type=jnp.float32)
            + b1_ref[...]
        )
    h1 = _leaky_relu(h1)

    h2 = (
        jnp.dot(w2_ref[...], h1, preferred_element_type=jnp.float32)  # (32,64)@(64,TB)
        + b2_ref[...]
    )
    h2 = _leaky_relu(h2)

    o_ref[...] = (
        jnp.dot(w3_ref[...], h2, preferred_element_type=jnp.float32)  # (1,32)@(32,TB)
        + b3_ref[...]
    )


def init_params(key, input_dim=1, dtype=jnp.float32):
    """PyTorch nn.Linear-style parameters: W is (out, in), b is (out,)."""
    dims = [(input_dim, 64), (64, 32), (32, 1)]
    params = []
    for fan_in, fan_out in dims:
        key, kw, kb = jax.random.split(key, 3)
        bound = 1.0 / jnp.sqrt(fan_in)
        w = jax.random.uniform(kw, (fan_out, fan_in), dtype, -bound, bound)
        b = jax.random.uniform(kb, (fan_out,), dtype, -bound, bound)
        params.extend([w, b])
    return tuple(params)


def generator_distribution(x, params, *, max_tile=512):
    """Forward pass. x: (B, input_dim) float32 -> (B, 1) float32."""
    w1, b1, w2, b2, w3, b3 = params
    B, d_in = x.shape

    # Batch tile on the lane axis: multiple of 128, capped (VMEM-safe on v7x's
    # 64 MiB too: per-tile buffers here are ~hundreds of KiB).
    TB = min(max_tile, _round_up(max(B, 1), 128))
    B_pad = _round_up(B, TB)

    # Transpose to (D_in, B) and zero-pad the batch to a multiple of TB.
    xT = jnp.zeros((d_in, B_pad), x.dtype).at[:, :B].set(x.T)

    # Column biases for the transposed layout.
    b1c = b1.reshape(-1, 1)
    b2c = b2.reshape(-1, 1)
    b3c = b3.reshape(-1, 1)

    grid = (B_pad // TB,)

    out = pl.pallas_call(
        partial(_mlp_kernel, d_in=d_in),
        out_shape=jax.ShapeDtypeStruct((1, B_pad), jnp.float32),
        grid=grid,
        in_specs=[
            # x tile moves with the grid; weights/biases stay resident
            # (constant index_map -> no re-DMA per batch tile).
            pl.BlockSpec((d_in, TB), lambda i: (0, i)),
            pl.BlockSpec(w1.shape, lambda i: (0, 0)),
            pl.BlockSpec(b1c.shape, lambda i: (0, 0)),
            pl.BlockSpec(w2.shape, lambda i: (0, 0)),
            pl.BlockSpec(b2c.shape, lambda i: (0, 0)),
            pl.BlockSpec(w3.shape, lambda i: (0, 0)),
            pl.BlockSpec(b3c.shape, lambda i: (0, 0)),
        ],
        out_specs=pl.BlockSpec((1, TB), lambda i: (0, i)),
        compiler_params=pltpu.CompilerParams(
            dimension_semantics=("parallel",),
        ),
    )(xT, w1, b1c, w2, b2c, w3, b3c)

    # Back to the PyTorch (B, 1) layout, dropping padded columns.
    return out[0, :B].reshape(B, 1)


def _reference(x, params):
    w1, b1, w2, b2, w3, b3 = params
    h = _leaky_relu(x @ w1.T + b1)
    h = _leaky_relu(h @ w2.T + b2)
    return h @ w3.T + b3


if __name__ == "__main__":
    key = jax.random.PRNGKey(0)
    k_param, k_x = jax.random.split(key)

    input_dim = 1
    batch = 8
    params = init_params(k_param, input_dim=input_dim)
    x = jax.random.normal(k_x, (batch, input_dim), dtype=jnp.float32)

    out = generator_distribution(x, params)
    out = jax.block_until_ready(out)

    ref = _reference(x, params)
    assert out.shape == (batch, 1), out.shape
    assert jnp.allclose(out, ref, atol=1e-5, rtol=1e-5), (out, ref)

    print("KERNEL_OK")
</pallas_src>

<mosaic_0001>
module attributes {stable_mosaic.version = 11 : i64} {
  func.func @_mlp_kernel(%arg0: i32, %arg1: memref<1x128xf32, #tpu.memory_space<vmem>>, %arg2: memref<64x1xf32, #tpu.memory_space<vmem>>, %arg3: memref<64x1xf32, #tpu.memory_space<vmem>>, %arg4: memref<32x64xf32, #tpu.memory_space<vmem>>, %arg5: memref<32x1xf32, #tpu.memory_space<vmem>>, %arg6: memref<1x32xf32, #tpu.memory_space<vmem>>, %arg7: memref<1x1xf32, #tpu.memory_space<vmem>>, %arg8: memref<1x128xf32, #tpu.memory_space<vmem>>) attributes {dimension_semantics = [#tpu.dimension_semantics<parallel>], iteration_bounds = array<i64: 1>, scalar_prefetch = 0 : i64, scratch_operands = 0 : i64, tpu.core_type = #tpu.core_type<tc>, window_params = [{transform_indices = @transform_0, window_bounds = array<i64: 1, 128>}, {pipeline_mode = #tpu.pipeline_mode<synchronous>, transform_indices = @transform_1, window_bounds = array<i64: 64, 1>}, {pipeline_mode = #tpu.pipeline_mode<synchronous>, transform_indices = @transform_2, window_bounds = array<i64: 64, 1>}, {pipeline_mode = #tpu.pipeline_mode<synchronous>, transform_indices = @transform_3, window_bounds = array<i64: 32, 64>}, {pipeline_mode = #tpu.pipeline_mode<synchronous>, transform_indices = @transform_4, window_bounds = array<i64: 32, 1>}, {pipeline_mode = #tpu.pipeline_mode<synchronous>, transform_indices = @transform_5, window_bounds = array<i64: 1, 32>}, {pipeline_mode = #tpu.pipeline_mode<synchronous>, transform_indices = @transform_6, window_bounds = array<i64: 1, 1>}, {transform_indices = @transform_7, window_bounds = array<i64: 1, 128>}]} {
    %c0 = arith.constant 0 : index
    %c0_0 = arith.constant 0 : index
    %0 = vector.load %arg1[%c0, %c0_0] : memref<1x128xf32, #tpu.memory_space<vmem>>, vector<1x128xf32>
    %c0_1 = arith.constant 0 : index
    %c0_2 = arith.constant 0 : index
    %1 = vector.load %arg2[%c0_1, %c0_2] : memref<64x1xf32, #tpu.memory_space<vmem>>, vector<64x1xf32>
    %2 = vector.broadcast %1 : vector<64x1xf32> to vector<64x128xf32>
    %3 = vector.broadcast %0 : vector<1x128xf32> to vector<64x128xf32>
    %4 = arith.mulf %2, %3 : vector<64x128xf32>
    %c0_3 = arith.constant 0 : index
    %c0_4 = arith.constant 0 : index
    %5 = vector.load %arg3[%c0_3, %c0_4] : memref<64x1xf32, #tpu.memory_space<vmem>>, vector<64x1xf32>
    %6 = vector.broadcast %5 : vector<64x1xf32> to vector<64x128xf32>
    %7 = arith.addf %4, %6 : vector<64x128xf32>
    %cst = arith.constant 0.000000e+00 : f32
    %8 = vector.broadcast %cst : f32 to vector<64x128xf32>
    %9 = arith.cmpf ogt, %7, %8 : vector<64x128xf32>
    %cst_5 = arith.constant 0.00999999977 : f32
    %10 = vector.broadcast %cst_5 : f32 to vector<64x128xf32>
    %11 = arith.mulf %10, %7 : vector<64x128xf32>
    %12 = arith.select %9, %7, %11 : vector<64x128xi1>, vector<64x128xf32>
    %c0_6 = arith.constant 0 : index
    %c0_7 = arith.constant 0 : index
    %13 = vector.load %arg4[%c0_6, %c0_7] : memref<32x64xf32, #tpu.memory_space<vmem>>, vector<32x64xf32>
    %cst_8 = arith.constant dense<0.000000e+00> : vector<32x128xf32>
    %14 = tpu.matmul %13, %12, %cst_8 {dimension_numbers = #tpu.dot_dimension_numbers<[1], [0], [0], [1], [0, 0, 1, 1], [], []>} : vector<32x64xf32>, vector<64x128xf32>, vector<32x128xf32> -> vector<32x128xf32>
    %c0_9 = arith.constant 0 : index
    %c0_10 = arith.constant 0 : index
    %15 = vector.load %arg5[%c0_9, %c0_10] : memref<32x1xf32, #tpu.memory_space<vmem>>, vector<32x1xf32>
    %16 = vector.broadcast %15 : vector<32x1xf32> to vector<32x128xf32>
    %17 = arith.addf %14, %16 : vector<32x128xf32>
    %cst_11 = arith.constant 0.000000e+00 : f32
    %18 = vector.broadcast %cst_11 : f32 to vector<32x128xf32>
    %19 = arith.cmpf ogt, %17, %18 : vector<32x128xf32>
    %cst_12 = arith.constant 0.00999999977 : f32
    %20 = vector.broadcast %cst_12 : f32 to vector<32x128xf32>
    %21 = arith.mulf %20, %17 : vector<32x128xf32>
    %22 = arith.select %19, %17, %21 : vector<32x128xi1>, vector<32x128xf32>
    %c0_13 = arith.constant 0 : index
    %c0_14 = arith.constant 0 : index
    %23 = vector.load %arg6[%c0_13, %c0_14] : memref<1x32xf32, #tpu.memory_space<vmem>>, vector<1x32xf32>
    %cst_15 = arith.constant dense<0.000000e+00> : vector<1x128xf32>
    %24 = tpu.matmul %23, %22, %cst_15 {dimension_numbers = #tpu.dot_dimension_numbers<[1], [0], [0], [1], [0, 0, 1, 1], [], []>} : vector<1x32xf32>, vector<32x128xf32>, vector<1x128xf32> -> vector<1x128xf32>
    %c0_16 = arith.constant 0 : index
    %c0_17 = arith.constant 0 : index
    %25 = vector.load %arg7[%c0_16, %c0_17] : memref<1x1xf32, #tpu.memory_space<vmem>>, vector<1x1xf32>
    %26 = vector.broadcast %25 : vector<1x1xf32> to vector<1x128xf32>
    %27 = arith.addf %24, %26 : vector<1x128xf32>
    %c0_18 = arith.constant 0 : index
    %c0_19 = arith.constant 0 : index
    %28 = vector.load %arg8[%c0_18, %c0_19] : memref<1x128xf32, #tpu.memory_space<vmem>>, vector<1x128xf32>
    tpu.vector_store %arg8[%c0_18, %c0_19], %27 {strides = array<i32>} : memref<1x128xf32, #tpu.memory_space<vmem>>, vector<1x128xf32>,
    return
  }
  func.func @transform_0(%arg0: i32) -> (i32, i32) {
    %c0_i32 = arith.constant 0 : i32
    %c0_i32_0 = arith.constant 0 : i32
    return %c0_i32, %arg0 : i32, i32
  }
  func.func @transform_1(%arg0: i32) -> (i32, i32) {
    %c0_i32 = arith.constant 0 : i32
    %c0_i32_0 = arith.constant 0 : i32
    %c0_i32_1 = arith.constant 0 : i32
    return %c0_i32, %c0_i32_0 : i32, i32
  }
  func.func @transform_2(%arg0: i32) -> (i32, i32) {
    %c0_i32 = arith.constant 0 : i32
    %c0_i32_0 = arith.constant 0 : i32
    %c0_i32_1 = arith.constant 0 : i32
    return %c0_i32, %c0_i32_0 : i32, i32
  }
  func.func @transform_3(%arg0: i32) -> (i32, i32) {
    %c0_i32 = arith.constant 0 : i32
    %c0_i32_0 = arith.constant 0 : i32
    %c0_i32_1 = arith.constant 0 : i32
    return %c0_i32, %c0_i32_0 : i32, i32
  }
  func.func @transform_4(%arg0: i32) -> (i32, i32) {
    %c0_i32 = arith.constant 0 : i32
    %c0_i32_0 = arith.constant 0 : i32
    %c0_i32_1 = arith.constant 0 : i32
    return %c0_i32, %c0_i32_0 : i32, i32
  }
  func.func @transform_5(%arg0: i32) -> (i32, i32) {
    %c0_i32 = arith.constant 0 : i32
    %c0_i32_0 = arith.constant 0 : i32
    %c0_i32_1 = arith.constant 0 : i32
    return %c0_i32, %c0_i32_0 : i32, i32
  }
  func.func @transform_6(%arg0: i32) -> (i32, i32) {
    %c0_i32 = arith.constant 0 : i32
    %c0_i32_0 = arith.constant 0 : i32
    %c0_i32_1 = arith.constant 0 : i32
    return %c0_i32, %c0_i32_0 : i32, i32
  }
  func.func @transform_7(%arg0: i32) -> (i32, i32) {
    %c0_i32 = arith.constant 0 : i32
    %c0_i32_0 = arith.constant 0 : i32
    return %c0_i32, %arg0 : i32, i32
  }
}

</mosaic_0001>

<bundles_post_ra>
// kernel: tpu_custom_call.1
= control target key start
LH: loop header
LB: loop body
LE: loop exit
PB: predicated region body
PF: predicated region fallthrough
CT: control target
= control target key end

     0   :  { %s661_s0 = inlined_call_operand.vmem [shape: f32[1,128], index: 0, kind: input, shape index: {}]   ;;  %s662_s1 = inlined_call_operand.vmem [shape: f32[64,1], index: 1, kind: input, shape index: {}]   ;;  %s663_s2 = inlined_call_operand.vmem [shape: f32[64,1], index: 2, kind: input, shape index: {}]   ;;  %s664_s3 = inlined_call_operand.vmem [shape: f32[32,64], index: 3, kind: input, shape index: {}]   ;;  %s665_s4 = inlined_call_operand.vmem [shape: f32[32,1], index: 4, kind: input, shape index: {}]   ;;  %s666_s5 = inlined_call_operand.vmem [shape: f32[1,32], index: 5, kind: input, shape index: {}]   ;;  %s667_s6 = inlined_call_operand.<no memory space> [shape: f32[1,1], index: 6, kind: input, shape index: {}]   ;;  %s668_s7 = inlined_call_operand.hbm [shape: f32[1,128], index: 7, kind: output, shape index: {}]  }
   0x1   :  { %v12_v0 = vstv %s667_s6 }
   0x2   :  { %13 = vst [vmem:[#allocation2] sm:$0x1] %v12_v0 }
   0x3   :  { %v92_v1 = vld [vmem:[%s663_s2] sm:$0xff]  ;;  %v519_v3 = vmov 0   ;;  %v93_v4 = vld [vmem:[%s663_s2 + $0x8] sm:$0xff]  ;;  %v33_v6 = vld [vmem:[%s662_s1 + $0x18] sm:$0xff] }
   0x4   :  { %v30_v2 = vld [vmem:[%s662_s1] sm:$0xff]  ;;  %494 = vset.pattern.permute.xlu1 %v519_v3  ;;  %493 = vset.pattern.permute.xlu0 %v519_v3  ;;  %v31_v5 = vld [vmem:[%s662_s1 + $0x8] sm:$0xff]  ;;  %v32_v7 = vld [vmem:[%s662_s1 + $0x10] sm:$0xff] }
   0x5   :  { %102 = vperm.xlu1 %494, %v92_v1   ;;  %40 = vperm.xlu0 %493, %v30_v2  }
   0x9   :  { %107 = vperm.xlu1 %494, %v93_v4   ;;  %45 = vperm.xlu0 %493, %v31_v5  }
   0xa   :  { %14 = vsyncpa [#allocation4], 0  ;;  %v95_v8 = vld [vmem:[%s663_s2 + $0x18] sm:$0xff]  ;;  %v94_v9 = vld [vmem:[%s663_s2 + $0x10] sm:$0xff]  ;;  %vm200_vm0 = vcmask 523264   ;;  %vm521_vm9 = vmmov 0  }
   0xb   :  { %v35_v10 = vld [vmem:[%s662_s1 + $0x28] sm:$0xff]  ;;  %v34_v11 = vld [vmem:[%s662_s1 + $0x20] sm:$0xff]  ;;  %v37_v14 = vld [vmem:[%s662_s1 + $0x38] sm:$0xff]  ;;  %vm321_vm14 = vcmask 261120   ;;  %s523_s25 = smov [#allocation3]  }
   0xc   :  { %v97_v12 = vld [vmem:[%s663_s2 + $0x28] sm:$0xff]  ;;  %v96_v13 = vld [vmem:[%s663_s2 + $0x20] sm:$0xff]  ;;  %v36_v15 = vld [vmem:[%s662_s1 + $0x30] sm:$0xff]  ;;  %s402_s26 = sshll.u32 %s523_s25, 4  ;;  %s403_s26 = int_to_ptr.vmem [resolvable:$true] %s402_s26 }
   0xd   :  { %55 = vperm.xlu1 %494, %v33_v6   ;;  %50 = vperm.xlu0 %493, %v32_v7   ;;  %v99_v16 = vld [vmem:[%s663_s2 + $0x38] sm:$0xff]  ;;  %v98_v17 = vld [vmem:[%s663_s2 + $0x30] sm:$0xff]  ;;  %v177_v18 = vld [vmem:[%s665_s4 + $0x8] sm:$0xff]  ;;  %s495_s27 = scalar_lea.vmem %s403_s26, 16  ;;  %s499_s28 = scalar_lea.vmem %s403_s26, 32 }
   0xe   :  { %v176_v19 = vld [vmem:[%s665_s4] sm:$0xff]  ;;  %v179_v20 = vld [vmem:[%s665_s4 + $0x18] sm:$0xff]  ;;  %v178_v21 = vld [vmem:[%s665_s4 + $0x10] sm:$0xff]  ;;  %p496_p0 = scmp.ne.s32.totalorder %s403_s26, %s495_s27  ;;  %p500_p1 = scmp.lt.s32.totalorder %s403_s26, %s403_s26 }
   0xf   :  { %v172_v22 = vld [vmem:[%s664_s3] sm:$0xff]  ;;  %p501_p2 = scmp.lt.s32.totalorder %s499_s28, %s495_s27 }
  0x10   :  { %v311_v23 = vld [vmem:[#allocation2] sm:$0x1]  ;;  %449 = vmatprep.mubr.msk.f32.mxu0 %vm200_vm0, %v172_v22 }
  0x11   :  { %117 = vperm.xlu1 %494, %v95_v8   ;;  %112 = vperm.xlu0 %493, %v94_v9   ;;  %v410_v24 = vld [vmem:[%s661_s0] ss:$0 sm:$0xff]  ;;  %p502_p3 = por %p501_p2, %p500_p1 }
  0x13   :  { %p503_p4 = pnand %p502_p3, %p496_p0 }
  0x15   :  { %65 = vperm.xlu1 %494, %v35_v10   ;;  %60 = vperm.xlu0 %493, %v34_v11  }
  0x19   :  { %127 = vperm.xlu1 %494, %v97_v12   ;;  %122 = vperm.xlu0 %493, %v96_v13   ;;  %v173_v13 = vld [vmem:[%s664_s3 + $0x8] sm:$0xff] }
  0x1d   :  { %75 = vperm.xlu1 %494, %v37_v14   ;;  %70 = vperm.xlu0 %493, %v36_v15   ;;  %v174_v14 = vld [vmem:[%s664_s3 + $0x10] sm:$0xff]  ;;  %v175_v15 = vld [vmem:[%s664_s3 + $0x18] sm:$0xff] }
  0x21   :  { %137 = vperm.xlu1 %494, %v99_v16   ;;  %132 = vperm.xlu0 %493, %v98_v17   ;;  %v520_v16 = vmov 0.0|0.0   ;;  %v522_v17 = vmov 0.0  }
  0x22   :  { %482 = vmatprep.subr.bf16.mxu1 %v520_v16  ;;  %463 = vmatprep.mubr.msk.f32.mxu1 %vm521_vm9, %v522_v17 }
  0x25   :  { %187 = vperm.xlu1 %494, %v177_v18   ;;  %182 = vperm.xlu0 %493, %v176_v19  }
  0x29   :  { %197 = vperm.xlu1 %494, %v179_v20   ;;  %192 = vperm.xlu0 %493, %v178_v21  }
  0x2d   :  { %314 = vperm.xlu0 %493, %v311_v23  }
  0x84   :  { %v103_v25 = vpop.permute.xlu1 %102  ;;  %v41_v26 = vpop.permute.xlu0 %40 }
  0x85   :  { %v84_v27 = vmul.f32 %v410_v24, %v41_v26 }
  0x87   :  { %v140_v28 = vadd.f32 %v103_v25, %v84_v27 }
  0x88   :  { %v108_v29 = vpop.permute.xlu1 %107  ;;  %v46_v30 = vpop.permute.xlu0 %45 }
  0x89   :  { %v85_v31 = vmul.f32 %v410_v24, %v46_v30  ;;  %v156_v33 = vmul.f32 0.01, %v140_v28  ;;  %vm148_vm1 = vcmp.gt.f32.partialorder %v140_v28, 0.0 }
  0x8b   :  { %v141_v32 = vadd.f32 %v108_v29, %v85_v31  ;;  %v164_v39 = vsel %vm148_vm1, %v140_v28, %v156_v33 }
  0x8c   :  { %v56_v34 = vpop.permute.xlu1 %55  ;;  %v51_v35 = vpop.permute.xlu0 %50 }
  0x8d   :  { %vm149_vm2 = vcmp.gt.f32.partialorder %v141_v32, 0.0  ;;  %v157_v36 = vmul.f32 0.01, %v141_v32  ;;  %v87_v37 = vmul.f32 %v410_v24, %v56_v34  ;;  %v86_v38 = vmul.f32 %v410_v24, %v51_v35 }
  0x8f   :  { %v165_v40 = vsel %vm149_vm2, %v141_v32, %v157_v36 }
  0x90   :  { %v118_v41 = vpop.permute.xlu1 %117  ;;  %v113_v42 = vpop.permute.xlu0 %112  ;;  %v466_v43 = vpack.c.bf16 %v165_v40, %v164_v39  ;;  %v310_v40 = vld [vmem:[%s666_s5] sm:$0x1] }
  0x91   :  { %v143_v44 = vadd.f32 %v118_v41, %v87_v37  ;;  %v142_v45 = vadd.f32 %v113_v42, %v86_v38  ;;  %v317_v41 = vlaneseq }
  0x92   :  { %467 = vmatprep.subr.bf16.mxu0 %v466_v43 }
  0x93   :  { %vm151_vm3 = vcmp.gt.f32.partialorder %v143_v44, 0.0  ;;  %v159_v46 = vmul.f32 0.01, %v143_v44  ;;  %vm150_vm4 = vcmp.gt.f32.partialorder %v142_v45, 0.0  ;;  %v158_v47 = vmul.f32 0.01, %v142_v45  ;;  %469 = vmatpush3.bf16.msra.mxu0 %v466_v43 }
  0x94   :  { %v66_v48 = vpop.permute.xlu1 %65  ;;  %v61_v49 = vpop.permute.xlu0 %60  ;;  %v318_v42 = vshrl.u32 %v317_v41, 7 }
  0x95   :  { %v166_v50 = vsel %vm150_vm4, %v142_v45, %v158_v47  ;;  %v167_v51 = vsel %vm151_vm3, %v143_v44, %v159_v46  ;;  %v89_v53 = vmul.f32 %v410_v24, %v66_v48  ;;  %v88_v54 = vmul.f32 %v410_v24, %v61_v49 }
  0x96   :  { %v470_v52 = vpack.c.bf16 %v167_v51, %v166_v50  ;;  %v319_v43 = vsub.s32 0, %v318_v42 }
  0x98   :  { %v128_v55 = vpop.permute.xlu1 %127  ;;  %v123_v56 = vpop.permute.xlu0 %122  ;;  %471 = vmatprep.subr.bf16.mxu0 %v470_v52 }
  0x99   :  { %v145_v57 = vadd.f32 %v128_v55, %v89_v53  ;;  %v144_v58 = vadd.f32 %v123_v56, %v88_v54  ;;  %473 = vmatpush3.bf16.msra.mxu0 %v470_v52 }
  0x9b   :  { %vm153_vm5 = vcmp.gt.f32.partialorder %v145_v57, 0.0  ;;  %v161_v59 = vmul.f32 0.01, %v145_v57  ;;  %vm152_vm6 = vcmp.gt.f32.partialorder %v144_v58, 0.0  ;;  %v160_v60 = vmul.f32 0.01, %v144_v58 }
  0x9c   :  { %v76_v61 = vpop.permute.xlu1 %75  ;;  %v71_v62 = vpop.permute.xlu0 %70 }
  0x9d   :  { %v168_v63 = vsel %vm152_vm6, %v144_v58, %v160_v60  ;;  %v169_v0 = vsel %vm153_vm5, %v145_v57, %v161_v59  ;;  %v91_v2 = vmul.f32 %v410_v24, %v76_v61  ;;  %v90_v3 = vmul.f32 %v410_v24, %v71_v62 }
  0x9e   :  { %v474_v1 = vpack.c.bf16 %v169_v0, %v168_v63 }
  0xa0   :  { %v138_v4 = vpop.permute.xlu1 %137  ;;  %v133_v5 = vpop.permute.xlu0 %132  ;;  %475 = vmatprep.subr.bf16.mxu0 %v474_v1 }
  0xa1   :  { %v147_v6 = vadd.f32 %v138_v4, %v91_v2  ;;  %v146_v7 = vadd.f32 %v133_v5, %v90_v3  ;;  %477 = vmatpush3.bf16.msra.mxu0 %v474_v1 }
  0xa3   :  { %vm155_vm7 = vcmp.gt.f32.partialorder %v147_v6, 0.0  ;;  %v163_v8 = vmul.f32 0.01, %v147_v6  ;;  %vm154_vm8 = vcmp.gt.f32.partialorder %v146_v7, 0.0  ;;  %v162_v9 = vmul.f32 0.01, %v146_v7 }
  0xa4   :  { %v188_v18 = vpop.permute.xlu1 %187  ;;  %v183_v19 = vpop.permute.xlu0 %182 }
  0xa5   :  { %v170_v10 = vsel %vm154_vm8, %v146_v7, %v162_v9  ;;  %v171_v11 = vsel %vm155_vm7, %v147_v6, %v163_v8 }
  0xa6   :  { %v478_v12 = vpack.c.bf16 %v171_v11, %v170_v10 }
  0xa8   :  { %479 = vmatprep.subr.bf16.mxu0 %v478_v12  ;;  %v198_v25 = vpop.permute.xlu1 %197  ;;  %v193_v28 = vpop.permute.xlu0 %192 }
  0xa9   :  { %481 = vmatpush3.bf16.msra.mxu0 %v478_v12 }
  0xac   :  { %450 = vmatmul.mubr.msk.f32.vlgmr.msra.gmra.mrb[0].mxu0 %vm200_vm0, %v173_v13  ;;  %v315_v44 = vpop.permute.xlu0 %314 }
  0xad   :  { %452 = vmatprep.mubr.msk.f32.mxu0 %vm200_vm0, %v174_v14  ;;  %v320_v45 = vrot.slane %v315_v44, %v319_v43 }
  0xb0   :  { %453 = vmatmul.mubr.msk.f32.gmra.mrb[2].mxu0 %vm200_vm0, %v175_v15 }
 0x17f   :  { %v451_v20 = vpop.f32.mrb[0].mxu0 }
 0x180   :  { %v285_v21 = vadd.f32 %v451_v20, %v188_v18  ;;  %v279_v22 = vpop.f32.mrb[1].mxu0 }
 0x181   :  { %v280_v23 = vadd.f32 %v279_v22, %v183_v19 }
 0x182   :  { %v303_v24 = vmul.f32 0.01, %v285_v21  ;;  %vm299_vm10 = vcmp.gt.f32.partialorder %v285_v21, 0.0 }
 0x183   :  { %v302_v26 = vmul.f32 0.01, %v280_v23  ;;  %v454_v27 = vpop.f32.mrb[2].mxu0  ;;  %vm298_vm11 = vcmp.gt.f32.partialorder %v280_v23, 0.0 }
 0x184   :  { %v295_v29 = vadd.f32 %v454_v27, %v198_v25  ;;  %v289_v30 = vpop.f32.mrb[3].mxu0  ;;  %v307_v31 = vsel %vm299_vm10, %v285_v21, %v303_v24 }
 0x185   :  { %v290_v32 = vadd.f32 %v289_v30, %v193_v28  ;;  %v306_v33 = vsel %vm298_vm11, %v280_v23, %v302_v26 }
 0x186   :  { %vm301_vm12 = vcmp.gt.f32.partialorder %v295_v29, 0.0  ;;  %v305_v34 = vmul.f32 0.01, %v295_v29  ;;  %v483_v35 = vpack.c.bf16 %v307_v31, %v306_v33 }
 0x187   :  { %vm300_vm13 = vcmp.gt.f32.partialorder %v290_v32, 0.0  ;;  %v304_v36 = vmul.f32 0.01, %v290_v32 }
 0x188   :  { %484 = vmatpush3.bf16.msra.mxu1 %v483_v35  ;;  %v309_v37 = vsel %vm301_vm12, %v295_v29, %v305_v34 }
 0x189   :  { %485 = vmatprep.subr.bf16.mxu1 %v520_v16  ;;  %v308_v38 = vsel %vm300_vm13, %v290_v32, %v304_v36 }
 0x18a   :  { %v486_v39 = vpack.c.bf16 %v309_v37, %v308_v38 }
 0x18c   :  { %487 = vmatpush3.bf16.msra.mxu1 %v486_v39 }
 0x18f   :  { %464 = vmatmul.mubr.msk.f32.vlgmr.msra.gmra.mrb[0].mxu1 %vm321_vm14, %v310_v40 }
 0x262   :  { %v391_v46 = vpop.f32.mrb[0].mxu1 }
 0x263   :  { %v392_v47 = vadd.f32 %v391_v46, %v320_v45  ;;  %v465_v48 = vpop.f32.mrb[1].mxu1 }
 0x265   :  { %395 = vst [vmem:[#allocation3] sm:$0x1] %v392_v47 }
 0x266   :  { %506 = shalt.err (!%p503_p4)
}
 0x267   :  { %s507_s30 = scalar_lea.hbm %s668_s7, 16 }
 0x268   :  { %p508_p5 = scmp.ne.s32.totalorder %s668_s7, %s507_s30  ;;  %p511_p6 = scmp.lt.u32.totalorder %s507_s30, %s668_s7 }
 0x26a   :  { %p513_p7 = pnand %p511_p6, %p508_p5 }
 0x26c   :  { %516 = shalt.err (!%p513_p7)
}
 0x26d   :  { %405 = dma.vmem_to_hbm [thread:$0]  %s403_s26, 16, %s668_s7, [#allocation4]  }
 0x26e   :  { %517 = dma.done.wait [#allocation4], 16  }
 0x26f   :  { %518 = vsyncadd [#allocation4], 4294967280 }
 0x270   :  { %409 = vsyncpa [#allocation4], 1 }

</bundles_post_ra>
